<compile_context>
chip_gen: v6e
topology: v6e:2x2x1
jax: 0.10.0
libtpu: 0.0.40
codegen_flags: <defaults>
</compile_context>

<pallas_src>
import math

import jax
import jax.numpy as jnp
from jax import lax
from jax.experimental import pallas as pl
from jax.experimental.pallas import tpu as pltpu


_VMEM_TARGET_BYTES = 24 * 1024 * 1024  # conservative per-step working set (all gens)


def _round_up(x, m):
    return (x + m - 1) // m * m


def _conv_tanh_kernel(x_ref, w_ref, o_ref, xs_ref):
    """One grid step = (batch block i, sequence tile j).

    x_ref : (bt, cp, L)       input block, native NCL layout, full L resident
    w_ref : (d_model, 3*cp)   folded conv taps [prev | mid | next], VMEM-resident
    o_ref : (bt, d_model, tl) output tile (tl on lanes -> unmasked, lane-dense stores)
    xs_ref: (bt, 3*cp, L)     VMEM scratch: tap-stacked circular neighbourhood
    """
    bt, cp, L = x_ref.shape
    tl = o_ref.shape[2]
    j = pl.program_id(1)

    # Build the tap-stacked input once per batch block (j == 0); it persists in
    # scratch across all sequence tiles of this batch block.  Circular taps are
    # XLU lane rotations of the *full* sequence, so tile edges are always right.
    @pl.when(j == 0)
    def _():
        for b in range(bt):                                   # one-time build
            x_b = x_ref[b]                                    # (cp, L)
            xs_ref[b, 0:cp, :] = pltpu.roll(x_b, 1, axis=1)   # x[(l-1) mod L]
            xs_ref[b, cp:2 * cp, :] = x_b                     # x[l]
            xs_ref[b, 2 * cp:3 * cp, :] = pltpu.roll(x_b, L - 1, axis=1)  # x[(l+1) mod L]

    start = pl.multiple_of(j * tl, tl)      # tl is a multiple of 128 (or == L)
    w = w_ref[...]                          # tiny; hoisted out of the batch loop

    def body(b, carry):
        xt = xs_ref[b, :, pl.ds(start, tl)]                   # (3*cp, tl), aligned
        acc = jnp.dot(w, xt, preferred_element_type=jnp.float32)  # one MXU matmul, K=3*cp
        o_ref[b] = jnp.tanh(acc).astype(o_ref.dtype)          # EUP tanh, lane-dense store
        return carry

    lax.fori_loop(0, bt, body, 0, unroll=True)


def _vmem_estimate(bt, tl, cp, L, d_model, in_bytes, out_bytes):
    x_blk = 2 * bt * cp * L * in_bytes                   # double-buffered input block
    o_blk = 2 * bt * d_model * tl * out_bytes            # double-buffered output block
    s_blk = bt * 3 * cp * L * in_bytes                   # tap-stacked scratch
    w_blk = 2 * d_model * max(3 * cp, 128) * in_bytes    # lane-padded folded weight
    return x_blk + o_blk + s_blk + w_blk


def _choose_blocks(B, cp, L, d_model, in_bytes, out_bytes, *,
                   max_block_b=8, block_l=None, vmem_target=_VMEM_TARGET_BYTES):
    # Sequence-tile candidates: multiples of 128 that divide L (largest first);
    # if L is not a multiple of 128 the whole sequence must live in one tile.
    if L % 128 == 0:
        l_cands = [t for t in range(L, 0, -128) if L % t == 0]
    else:
        l_cands = [L]
    if block_l is not None:
        assert block_l in l_cands, "block_l must divide L and be a multiple of 128 (or == L)"
        l_cands = [t for t in l_cands if t <= block_l]
    # Keep >= 2 grid steps along batch so megacore (v7x) has work to shard.
    bt = max(1, min(max_block_b, B // 2 if B >= 2 else 1))
    tl = l_cands[0]
    while _vmem_estimate(bt, tl, cp, L, d_model, in_bytes, out_bytes) > vmem_target:
        if bt > 1:
            bt = max(1, bt // 2)                     # shrink batch block first
        else:
            smaller = [t for t in l_cands if t < tl]
            if not smaller:
                break                                # rely on vmem_limit headroom
            tl = smaller[0]
    est = _vmem_estimate(bt, tl, cp, L, d_model, in_bytes, out_bytes)
    return bt, tl, est


def sensor_token_embedding(x, weight, *, max_block_b=8, block_l=None, io_dtype=None):
    """tanh(Conv1d(c_in->d_model, k=3, padding=1, circular, bias=False)(x)).

    x:      (B, c_in, L) float
    weight: (d_model, c_in, 3) conv weight (PyTorch layout)
    io_dtype: optionally run I/O in bf16 on v6e/v7x (f32 accumulation kept).
    Returns (B, d_model, L).
    """
    B, c_in, L = x.shape
    d_model = weight.shape[0]
    assert weight.shape == (d_model, c_in, 3)

    if io_dtype is not None:
        x = x.astype(io_dtype)
        weight = weight.astype(io_dtype)
    out_dtype = x.dtype

    # Pad channels to a sublane multiple so the in-kernel tap stack is aligned;
    # the zero channels are folded into the weight and contribute nothing.
    cp = _round_up(c_in, 8)
    if cp != c_in:
        x = jnp.pad(x, ((0, 0), (0, cp - c_in), (0, 0)))

    # Fold the 3 taps into one (d_model, 3*cp) matrix -> single K=3*cp matmul.
    # Tap order matches the in-kernel stack: [prev | mid | next].
    w_taps = jnp.transpose(weight, (2, 0, 1))                  # (3, d_model, c_in)
    if cp != c_in:
        w_taps = jnp.pad(w_taps, ((0, 0), (0, 0), (0, cp - c_in)))
    w_folded = jnp.concatenate([w_taps[0], w_taps[1], w_taps[2]], axis=1)  # (d_model, 3*cp)

    in_bytes = jnp.dtype(x.dtype).itemsize
    out_bytes = jnp.dtype(out_dtype).itemsize
    bt, tl, est = _choose_blocks(B, cp, L, d_model, in_bytes, out_bytes,
                                 max_block_b=max_block_b, block_l=block_l)
    grid = (pl.cdiv(B, bt), L // tl)

    out = pl.pallas_call(
        _conv_tanh_kernel,
        out_shape=jax.ShapeDtypeStruct((B, d_model, L), out_dtype),
        grid=grid,
        in_specs=[
            pl.BlockSpec((bt, cp, L), lambda i, j: (i, 0, 0)),      # resident over j
            pl.BlockSpec((d_model, 3 * cp), lambda i, j: (0, 0)),   # resident weight
        ],
        out_specs=pl.BlockSpec((bt, d_model, tl), lambda i, j: (i, 0, j)),
        scratch_shapes=[pltpu.VMEM((bt, 3 * cp, L), x.dtype)],
        compiler_params=pltpu.CompilerParams(
            dimension_semantics=("parallel", "arbitrary"),
            vmem_limit_bytes=int(min(64 << 20, max(32 << 20, 2 * est))),
        ),
    )(x, w_folded)
    return out


def init_conv_weight(key, c_in, d_model, ksize=3):
    """kaiming_normal_(mode='fan_in', nonlinearity='leaky_relu') equivalent."""
    fan_in = c_in * ksize
    gain = math.sqrt(2.0)   # leaky_relu gain with PyTorch default a=0
    std = gain / math.sqrt(fan_in)
    return std * jax.random.normal(key, (d_model, c_in, ksize), jnp.float32)


if __name__ == "__main__":
    # Small demo shapes.  L=256 with block_l=128 exercises the sequence-tiling
    # axis (circular edges across tiles) and B=2 gives a 2-step parallel batch
    # axis; c_in=4 exercises the channel padding (4 -> 8) path.
    B, c_in, L, d_model = 2, 4, 256, 32

    key = jax.random.PRNGKey(0)
    kx, kw = jax.random.split(key)
    x = jax.random.normal(kx, (B, c_in, L), jnp.float32)   # PyTorch NCL layout
    w = init_conv_weight(kw, c_in, d_model)                # (d_model, c_in, 3)

    y = sensor_token_embedding(x, w, block_l=128)
    jax.block_until_ready(y)

    # Pure-JAX reference: circular pad (1 each side) + Conv1d (no flip) + tanh.
    xp = jnp.concatenate([x[:, :, -1:], x, x[:, :, :1]], axis=-1)  # (B, c_in, L+2)
    ref = jnp.zeros((B, d_model, L), jnp.float32)
    for t in range(3):
        ref = ref + jnp.einsum("oc,bcl->bol", w[:, :, t], xp[:, :, t:t + L],
                               precision=lax.Precision.HIGHEST)
    ref = jnp.tanh(ref)

    assert y.shape == (B, d_model, L)
    assert jnp.allclose(y, ref, atol=1e-5, rtol=1e-5), "mismatch vs reference"

    print("KERNEL_OK")
</pallas_src>

<mosaic_0001>
module attributes {stable_mosaic.version = 11 : i64} {
  func.func @_conv_tanh_kernel(%arg0: i32, %arg1: i32, %arg2: memref<1x8x256xf32, #tpu.memory_space<vmem>>, %arg3: memref<32x24xf32, #tpu.memory_space<vmem>>, %arg4: memref<1x32x128xf32, #tpu.memory_space<vmem>>, %arg5: memref<1x24x256xf32, #tpu.memory_space<vmem>>) attributes {dimension_semantics = [#tpu.dimension_semantics<parallel>, #tpu.dimension_semantics<arbitrary>], iteration_bounds = array<i64: 2, 2>, scalar_prefetch = 0 : i64, scratch_operands = 1 : i64, tpu.core_type = #tpu.core_type<tc>, window_params = [{transform_indices = @transform_0, window_bounds = array<i64: 1, 8, 256>}, {pipeline_mode = #tpu.pipeline_mode<synchronous>, transform_indices = @transform_1, window_bounds = array<i64: 32, 24>}, {transform_indices = @transform_2, window_bounds = array<i64: 1, 32, 128>}]} {
    %c0_i32 = arith.constant 0 : i32
    %0 = arith.cmpi eq, %arg1, %c0_i32 : i32
    %1 = arith.extui %0 : i1 to i32
    %c0_i32_0 = arith.constant 0 : i32
    %2 = arith.cmpi ne, %1, %c0_i32_0 : i32
    scf.if %2 {
      %c0_6 = arith.constant 0 : index
      %c0_7 = arith.constant 0 : index
      %c0_8 = arith.constant 0 : index
      %16 = vector.load %arg2[%c0_6, %c0_7, %c0_8] : memref<1x8x256xf32, #tpu.memory_space<vmem>>, vector<1x8x256xf32>
      %17 = vector.shape_cast %16 : vector<1x8x256xf32> to vector<8x256xf32>
      %c1_i32_9 = arith.constant 1 : i32
      %18 = tpu.dynamic_rotate %17 by %c1_i32_9 dim 1 : vector<8x256xf32>, i32 -> vector<8x256xf32>
      %c0_10 = arith.constant 0 : index
      %c0_11 = arith.constant 0 : index
      %c0_12 = arith.constant 0 : index
      %19 = vector.load %arg5[%c0_10, %c0_11, %c0_12] : memref<1x24x256xf32, #tpu.memory_space<vmem>>, vector<1x8x256xf32>
      %20 = vector.shape_cast %19 : vector<1x8x256xf32> to vector<8x256xf32>
      %21 = vector.shape_cast %18 : vector<8x256xf32> to vector<1x8x256xf32>
      tpu.vector_store %arg5[%c0_10, %c0_11, %c0_12], %21 {strides = array<i32>} : memref<1x24x256xf32, #tpu.memory_space<vmem>>, vector<1x8x256xf32>,
      %c0_13 = arith.constant 0 : index
      %c8 = arith.constant 8 : index
      %c0_14 = arith.constant 0 : index
      %22 = vector.load %arg5[%c0_13, %c8, %c0_14] : memref<1x24x256xf32, #tpu.memory_space<vmem>>, vector<1x8x256xf32>
      %23 = vector.shape_cast %22 : vector<1x8x256xf32> to vector<8x256xf32>
      %24 = vector.shape_cast %17 : vector<8x256xf32> to vector<1x8x256xf32>
      tpu.vector_store %arg5[%c0_13, %c8, %c0_14], %24 {strides = array<i32>} : memref<1x24x256xf32, #tpu.memory_space<vmem>>, vector<1x8x256xf32>,
      %c255_i32 = arith.constant 255 : i32
      %25 = tpu.dynamic_rotate %17 by %c255_i32 dim 1 : vector<8x256xf32>, i32 -> vector<8x256xf32>
      %c0_15 = arith.constant 0 : index
      %c16 = arith.constant 16 : index
      %c0_16 = arith.constant 0 : index
      %26 = vector.load %arg5[%c0_15, %c16, %c0_16] : memref<1x24x256xf32, #tpu.memory_space<vmem>>, vector<1x8x256xf32>
      %27 = vector.shape_cast %26 : vector<1x8x256xf32> to vector<8x256xf32>
      %28 = vector.shape_cast %25 : vector<8x256xf32> to vector<1x8x256xf32>
      tpu.vector_store %arg5[%c0_15, %c16, %c0_16], %28 {strides = array<i32>} : memref<1x24x256xf32, #tpu.memory_space<vmem>>, vector<1x8x256xf32>,
    } else {
    }
    %c128_i32 = arith.constant 128 : i32
    %3 = arith.muli %arg1, %c128_i32 : i32
    %4 = tpu.assume_multiple %3, 128 : i32
    %c0 = arith.constant 0 : index
    %c0_1 = arith.constant 0 : index
    %5 = vector.load %arg3[%c0, %c0_1] : memref<32x24xf32, #tpu.memory_space<vmem>>, vector<32x24xf32>
    %c0_i32_2 = arith.constant 0 : i32
    %6 = arith.index_cast %c0_i32_2 : i32 to index
    %c0_3 = arith.constant 0 : index
    %7 = arith.index_cast %4 : i32 to index
    %8 = vector.load %arg5[%6, %c0_3, %7] : memref<1x24x256xf32, #tpu.memory_space<vmem>>, vector<1x24x128xf32>
    %9 = vector.shape_cast %8 : vector<1x24x128xf32> to vector<24x128xf32>
    %cst = arith.constant dense<0.000000e+00> : vector<32x128xf32>
    %10 = tpu.matmul %5, %9, %cst {dimension_numbers = #tpu.dot_dimension_numbers<[1], [0], [0], [1], [0, 0, 1, 1], [], []>} : vector<32x24xf32>, vector<24x128xf32>, vector<32x128xf32> -> vector<32x128xf32>
    %11 = math.tanh %10 : vector<32x128xf32>
    %12 = arith.index_cast %c0_i32_2 : i32 to index
    %c0_4 = arith.constant 0 : index
    %c0_5 = arith.constant 0 : index
    %13 = vector.load %arg4[%12, %c0_4, %c0_5] : memref<1x32x128xf32, #tpu.memory_space<vmem>>, vector<1x32x128xf32>
    %14 = vector.shape_cast %13 : vector<1x32x128xf32> to vector<32x128xf32>
    %15 = vector.shape_cast %11 : vector<32x128xf32> to vector<1x32x128xf32>
    tpu.vector_store %arg4[%12, %c0_4, %c0_5], %15 {strides = array<i32>} : memref<1x32x128xf32, #tpu.memory_space<vmem>>, vector<1x32x128xf32>,
    %c1_i32 = arith.constant 1 : i32
    return
  }
  func.func @transform_0(%arg0: i32, %arg1: i32) -> (i32, i32, i32) {
    %c0_i32 = arith.constant 0 : i32
    %c0_i32_0 = arith.constant 0 : i32
    %c0_i32_1 = arith.constant 0 : i32
    return %arg0, %c0_i32, %c0_i32_0 : i32, i32, i32
  }
  func.func @transform_1(%arg0: i32, %arg1: i32) -> (i32, i32) {
    %c0_i32 = arith.constant 0 : i32
    %c0_i32_0 = arith.constant 0 : i32
    %c0_i32_1 = arith.constant 0 : i32
    return %c0_i32, %c0_i32_0 : i32, i32
  }
  func.func @transform_2(%arg0: i32, %arg1: i32) -> (i32, i32, i32) {
    %c0_i32 = arith.constant 0 : i32
    %c0_i32_0 = arith.constant 0 : i32
    return %arg0, %c0_i32, %arg1 : i32, i32, i32
  }
}

</mosaic_0001>

<bundles_post_ra>
// kernel: tpu_custom_call.1
= control target key start
LH: loop header
LB: loop body
LE: loop exit
PB: predicated region body
PF: predicated region fallthrough
CT: control target
= control target key end

     0   :  { %7 = vsyncpa [#allocation4], 0  ;;  %s805_s0 = inlined_call_operand.vmem [shape: f32[2,8,256], index: 0, kind: input, shape index: {}]   ;;  %s806_s1 = inlined_call_operand.vmem [shape: f32[32,24], index: 1, kind: input, shape index: {}]   ;;  %s807_s2 = inlined_call_operand.hbm [shape: f32[2,32,256], index: 2, kind: output, shape index: {}]  }
   0x1   :  { %9 = vsyncpa [#allocation4 + $0x1], 0  ;;  %s639_s9 = smov 0   ;;  %s641_s10 = smov 0  }
   0x2   :  { %s643_s11 = smov 0   ;;  %s645_s12 = smov 0  }
   0x3   :  { %s647_s13 = smov 0   ;;  %s649_s14 = smov 0  }
   0x4   :  { %s651_s15 = smov 0   ;;  %s653_s16 = smov 0  }
   0x5 LB: > { %s394_s17 = sadd.s32 4294967295, %s616_s16   ;;  %s395_s18 = sadd.s32 4294967294, %s616_s16   ;;  %s616_s16 = sphi %s653_s16, %s15_s16   ;;  %s612_s15 = sphi %s651_s15, %s816_s15   ;;  %s608_s14 = sphi %s649_s14, %s815_s14   ;;  %s604_s13 = sphi %s647_s13, %s814_s13   ;;  %s600_s12 = sphi %s645_s12, %s813_s12   ;;  %s596_s11 = sphi %s643_s11, %s812_s11   ;;  %s592_s10 = sphi %s641_s10, %s811_s10   ;;  %s588_s9 = sphi %s639_s9, %s810_s9  }
   0x6   : > { %s24_s19 = sadd.s32 1, %s608_s14  ;;  %s27_s20 = sadd.s32 1, %s612_s15 }
   0x7   : > { %p25_p0 = scmp.ge.s32.totalorder %s24_s19, 2  ;;  %p93_p1 = scmp.ne.s32.totalorder %s596_s11, %s592_s10 }
   0x8   : > { %p94_p2 = scmp.eq.s32.totalorder %s394_s17, 3  ;;  %p99_p5 = scmp.ne.s32.totalorder %s592_s10, %s588_s9 }
   0x9   : > { %s818_s19 = smov (%p25_p0, %s24_s19), 0  ;;  %s820_s20 = smov (!%p25_p0, %s27_s20), %s612_s15 }
   0xa   : > { %s79_s21 = ssub.s32 %s608_s14, %s818_s19  ;;  %p690_p3 = por %p94_p2, %p93_p1 }
   0xb   : > { %p29_p4 = scmp.ge.s32.totalorder %s820_s20, 2  ;;  %p100_p6 = scmp.eq.s32.totalorder %s395_s18, 3 }
   0xc   : > { %p398_p7 = scmp.ge.s32.totalorder %s616_s16, 1  ;;  %p129_p9 = scmp.lt.s32.totalorder %s616_s16, 5 }
   0xd   : > { %s822_s20 = smov (%p29_p4, %s820_s20), 0  ;;  %p699_p8 = por %p100_p6, %p99_p5 }
   0xe   : > { %s78_s24 = ssub.s32 %s612_s15, %s822_s20  ;;  %s83_s25 = sadd.s32 1, %s596_s11 }
   0xf   : > { %s80_s26 = sor.u32 %s79_s21, %s78_s24  ;;  %p130_p10 = pnand %p398_p7, %p129_p9 }
  0x10   : > { %p81_p11 = scmp.eq.s32.totalorder %s80_s26, 0  ;;  %s148_s28 = sand.u32 (!%p130_p10), 1, %s592_s10  }
  0x11   : > { %133 = sbr.rel (%p130_p10) target bundleno = 389 (0x185), region = 28  ;;  %p151_p12 = scmp.lt.s32.totalorder (!%p130_p10), %s604_s13, 1 }
  0x12   : > { %s708_s27 = scalar_select %p81_p11, %s596_s11, %s83_s25  }
  0x13   : > { %s399_s29 = sshll.u32 (!%p130_p10), %s148_s28, 5  ;;  %p402_p13 = scmp.ne.s32.totalorder (!%p130_p10), %s600_s12, 0 }
  0x14   : > { %s718_s7 = scalar_lea.vmem (!%p130_p10), [#allocation3], %s399_s29 }
  0x16   : > { %s152_s30 = scalar_select %p151_p12, %s604_s13, 1 }
  0x17   : > { %159 = sbr.rel (%p402_p13) target bundleno = 151 (0x97), region = 32  ;;  %s618_s8 = smov (!%p402_p13), 127  }
  0x18   : > { %s414_s3 = sshll.u32 %s152_s30, 4  ;;  %s619_s17 = smov (!%p402_p13), 1  }
  0x19   : > { %s155_s6 = scalar_lea.vmem %s805_s0, %s414_s3 }
  0x1c   : > { %v160_v0 = vld [vmem:[%s155_s6] sm:$0xff]  ;;  %v161_v1 = vld [vmem:[%s155_s6 + $0x8] sm:$0xff]  ;;  %v166_v2 = vlaneseq }
  0x1d   : > { %175 = vrot.lane.b32.xlu1 %v160_v0, %s618_s8  ;;  %173 = vst [vmem:[#allocation2 + $0x10] sm:$0xff] %v160_v0  ;;  %162 = vrot.lane.b32.xlu0 %v160_v0, %s619_s17  ;;  %174 = vst [vmem:[#allocation2 + $0x18] sm:$0xff] %v161_v1 }
  0x1e   : > { %v167_v3 = vand.u32 127, %v166_v2 }
  0x20   : > { %vm179_vm0 = vcmp.lt.s32.totalorder %v167_v3, 127  ;;  %vm168_vm1 = vcmp.lt.s32.totalorder %v167_v3, 1 }
  0x21   : > { %177 = vrot.lane.b32.xlu1 %v161_v1, %s618_s8  ;;  %164 = vrot.lane.b32.xlu0 %v161_v1, %s619_s17 }
  0x8f   : > { %v176_v4 = vpop.permute.xlu1 %175  ;;  %v163_v5 = vpop.permute.xlu0 %162 }
  0x93   : > { %v178_v6 = vpop.permute.xlu1 %177  ;;  %v165_v7 = vpop.permute.xlu0 %164 }
  0x94   : > { %v180_v8 = vsel %vm179_vm0, %v176_v4, %v178_v6  ;;  %v181_v9 = vsel %vm179_vm0, %v178_v6, %v176_v4  ;;  %v169_v10 = vsel %vm168_vm1, %v163_v5, %v165_v7  ;;  %v170_v11 = vsel %vm168_vm1, %v165_v7, %v163_v5 }
  0x95   : > { %182 = vst [vmem:[#allocation2 + $0x20] sm:$0xff] %v180_v8  ;;  %183 = vst [vmem:[#allocation2 + $0x28] sm:$0xff] %v181_v9 }
  0x96   : > { %171 = vst [vmem:[#allocation2] sm:$0xff] %v170_v11  ;;  %172 = vst [vmem:[#allocation2 + $0x8] sm:$0xff] %v169_v10 }
  0x97 PF: > { %s403_s18 = sshll.u32 %s600_s12, 7  ;;  %v185_v12 = vld [vmem:[%s806_s1] sm:$0xff]  ;;  %vm196_vm2 = vcmask 195584   ;;  %v187_v13 = vld [vmem:[%s806_s1 + $0x10] sm:$0xff]  ;;  %v186_v17 = vld [vmem:[%s806_s1 + $0x8] sm:$0xff]  ;;  %s410_s17 = sshll.u32 %s604_s13, 3 }
  0x98   : > { %s189_s29 = sshra.s32 %s403_s18, 7  ;;  %428 = vmatprep.mubr.msk.f32.mxu0 %vm196_vm2, %v185_v12  ;;  %431 = vmatprep.mubr.msk.f32.mxu1 %vm196_vm2, %v187_v13  ;;  %v188_v18 = vld [vmem:[%s806_s1 + $0x18] sm:$0xff]  ;;  %s314_s18 = sadd.s32 %s600_s12, %s410_s17 }
  0x99   : > { %s404_s30 = sshll.u32 %s189_s29, 3  ;;  %s411_s21 = sshll.u32 %s314_s18, 7 }
  0x9a   : > { %s192_s3 = scalar_lea.vmem [#allocation2], %s404_s30  ;;  %s317_s24 = sshll.u32 %s718_s7, 4  ;;  %s747_s24 = int_to_ptr.vmem [resolvable:$true] %s317_s24 }
  0x9b   : > { %s744_s29 = scalar_lea.hbm %s807_s2, %s411_s21  ;;  %s754_s12 = scalar_lea.sflag [#allocation4], %s148_s28 }
  0x9c   : > { %s524_s13 = scalar_lea.vmem %s747_s24, 512  ;;  %s620_s30 = smov [#allocation3]  }
  0x9d   : > { %v195_v14 = vld [vmem:[%s192_s3 + $0x20] sm:$0xff]  ;;  %v194_v15 = vld [vmem:[%s192_s3 + $0x10] sm:$0xff]  ;;  %p525_p0 = scmp.ne.s32.totalorder %s747_s24, %s524_s13 }
  0x9e   : > { %422 = vmatprep.subr.mxu0 %v195_v14  ;;  %434 = vmatprep.subr.mxu1 %v195_v14  ;;  %v193_v16 = vld [vmem:[%s192_s3] sm:$0xff]  ;;  %s528_s3 = sshll.u32 %s620_s30, 4  ;;  %s529_s3 = int_to_ptr.vmem [resolvable:$false] %s528_s3 }
  0x9f   : > { %423 = vmatpush3.msra.mxu0 %v195_v14  ;;  %437 = vmatpush3.msra.mxu1 %v195_v14  ;;  %p526_p1 = pnand %p525_p0, %p690_p3  ;;  %s530_s4 = scalar_lea.vmem %s529_s3, 1024 }
  0xa0   : > { %424 = vmatprep.subr.mxu0 %v194_v15  ;;  %435 = vmatprep.subr.mxu1 %v194_v15  ;;  %p531_p4 = scmp.lt.s32.totalorder %s747_s24, %s529_s3  ;;  %p532_p5 = scmp.lt.s32.totalorder %s530_s4, %s524_s13 }
  0xa1   : > { %425 = vmatpush3.msra.mxu0 %v194_v15  ;;  %438 = vmatpush3.msra.mxu1 %v194_v15  ;;  %p527_p2 = pneg %p526_p1 }
  0xa2   : > { %426 = vmatprep.subr.mxu0 %v193_v16  ;;  %436 = vmatprep.subr.mxu1 %v193_v16  ;;  %p533_p6 = por %p532_p5, %p531_p4 }
  0xa3   : > { %427 = vmatpush3.msra.mxu0 %v193_v16  ;;  %439 = vmatpush3.msra.mxu1 %v193_v16 }
  0xa4   : > { %429 = vmatmul.mubr.msk.f32.vlgmr.msra.gmra.mxu0 %vm196_vm2, %v186_v17  ;;  %432 = vmatmul.mubr.msk.f32.vlgmr.msra.gmra.mxu1 %vm196_vm2, %v188_v18  ;;  %p534_p7 = pnand %p533_p6, %p527_p2 }
 0x164   : > { %v430_v19 = vpop.f32.mrf.mxu0  ;;  %v433_v20 = vpop.f32.mrf.mxu1 }
 0x165   : > { %516 = vtanh.f32 %v430_v19 }
 0x166   : > { %518 = vtanh.f32 %v433_v20  ;;  %v275_v21 = vpop.f32.mrf.mxu0  ;;  %v285_v22 = vpop.f32.mrf.mxu1 }
 0x167   : > { %520 = vtanh.f32 %v275_v21 }
 0x168   : > { %522 = vtanh.f32 %v285_v22 }
 0x172   : > { %v517_v23 = vpop.eup %516 }
 0x173   : > { %v519_v24 = vpop.eup %518  ;;  %299 = vst [vmem:[%s718_s7 + $0x8] sm:$0xff] %v517_v23 }
 0x174   : > { %v521_v25 = vpop.eup %520  ;;  %301 = vst [vmem:[%s718_s7 + $0x18] sm:$0xff] %v519_v24 }
 0x175   : > { %v523_v26 = vpop.eup %522  ;;  %298 = vst [vmem:[%s718_s7] sm:$0xff] %v521_v25 }
 0x176   : > { %300 = vst [vmem:[%s718_s7 + $0x10] sm:$0xff] %v523_v26 }
 0x177   : > { %537 = shalt.err (!%p534_p7)
}
 0x178   : > { %s538_s28 = scalar_lea.hbm %s744_s29, 512  ;;  %s542_s6 = scalar_lea.hbm %s807_s2, 2048 }
 0x179   : > { %p539_p9 = scmp.ne.s32.totalorder %s744_s29, %s538_s28  ;;  %p543_p12 = scmp.lt.s32.totalorder %s744_s29, %s807_s2 }
 0x17a   : > { %p544_p13 = scmp.lt.s32.totalorder %s542_s6, %s538_s28 }
 0x17b   : > { %p540_p10 = pnand %p539_p9, %p690_p3 }
 0x17c   : > { %p545_p0 = por %p544_p13, %p543_p12 }
 0x17d   : > { %p541_p11 = pneg %p540_p10 }
 0x17f   : > { %p546_p1 = pnand %p545_p0, %p541_p11 }
 0x181   : > { %549 = shalt.err (!%p546_p1)
}
 0x182   : > { %s621_s18 = smov 128   ;;  %s622_s21 = smov 256  }
 0x183   : > { %s623_s25 = smov 8  }
 0x184   : > { %440 = dma.vmem_to_hbm [thread:$0]  (%p690_p3), %s747_s24, 512, %s744_s29, %s754_s12, %s621_s18, %s622_s21, %s623_s25  }
 0x185 PF: > { %p446_p2 = scmp.ge.s32.totalorder %s616_s16, 2  ;;  %s332_s26 = sand.u32 1, %s588_s9  }
 0x186   : > { %s333_s13 = scalar_lea.sflag [#allocation4], %s332_s26 }
 0x187   : > { %p443_p4 = pnand %p446_p2, %p699_p8 }
 0x189   : > { %p444_p5 = pneg %p443_p4 }
 0x18b   : > { %583 = dma.done.wait (%p444_p5), %s333_s13, 512  }
 0x18c   : > { %585 = vsyncadd (%p444_p5), %s333_s13, 4294966784  ;;  %s15_s16 = sadd.s32 1, %s616_s16   ;;  %s810_s9 = smov %s592_s10 }
 0x18d   : > { %p12_p6 = scmp.ge.s32.totalorder %s15_s16, 6   ;;  %s811_s10 = smov %s596_s11 }
 0x18e   : > { %s812_s11 = smov %s708_s27  ;;  %s813_s12 = smov %s608_s14 }
 0x18f   : > { %s814_s13 = smov %s612_s15  ;;  %s815_s14 = smov %s818_s19 }
 0x190   : > { %s816_s15 = smov %s822_s20  ;;  %14 = sbr.rel (!%p12_p6) target bundleno = 5 (0x5), region = 68 }
 0x195   :  { %338 = vsyncpa [#allocation4], 1 }
 0x196   :  { %340 = vsyncpa [#allocation4 + $0x1], 1 }

</bundles_post_ra>
